<compile_context>
chip_gen: v6e
topology: v6e:2x2x1
jax: 0.10.0
libtpu: 0.0.40
codegen_flags: <defaults>
</compile_context>

<pallas_src>
import functools

import jax
import jax.numpy as jnp
from jax import lax
from jax.experimental import pallas as pl
from jax.experimental.pallas import tpu as pltpu


def _round_up(x: int, m: int) -> int:
    return (x + m - 1) // m * m


def _default_bf16_epilogue() -> bool:
    """bf16 bias-add/ReLU only where the VPU has a bf16 ALU (v6e / v7x)."""
    try:
        kind = jax.devices()[0].device_kind.lower()
    except Exception:  # pragma: no cover - conservative fallback
        return False
    return not any(t in kind for t in ("v2", "v3", "v4", "v5"))


# ---------------------------------------------------------------------------
# Kernel
# ---------------------------------------------------------------------------
def critic_kernel(s_ref, a_ref,
                  w1s_ref, w1a_ref, b1_ref,
                  w2_ref, b2_ref,
                  w3_ref, b3_ref,
                  w4t_ref, b4_ref,
                  o_ref, *, bf16_epilogue):
    """Fused 4-layer MLP.  bf16 MXU operands, f32 accumulation, lane-dense output."""
    s = s_ref[...].astype(jnp.bfloat16)          # (TM, S)   cast rides spare VPU slots
    a = a_ref[...].astype(jnp.bfloat16)          # (TM, A)

    def act(acc_f32, b_ref):
        # bias-add + ReLU; result is bf16 either way (next matmul operand).
        if bf16_epilogue:                        # v6e/v7x: bf16 vregs -> ~half the VALU work
            return jnp.maximum(acc_f32.astype(jnp.bfloat16)
                               + b_ref[...].astype(jnp.bfloat16), 0)
        return jnp.maximum(acc_f32 + b_ref[...], 0.0).astype(jnp.bfloat16)

    # Layer 1: split-concat matmul  (== concat([s, a]) @ W1)
    h = act(jnp.dot(s, w1s_ref[...], preferred_element_type=jnp.float32)
            + jnp.dot(a, w1a_ref[...], preferred_element_type=jnp.float32), b1_ref)
    # Layers 2, 3
    h = act(jnp.dot(h, w2_ref[...], preferred_element_type=jnp.float32), b2_ref)
    h = act(jnp.dot(h, w3_ref[...], preferred_element_type=jnp.float32), b3_ref)

    # Layer 4, transposed: (8, H) x (TM, H)^T -> (8, TM).  Only row 0 is real; the
    # batch lands on the lane axis, so the store is lane-dense and tiny.
    q_t = lax.dot_general(w4t_ref[...], h,
                          dimension_numbers=(((1,), (1,)), ((), ())),
                          preferred_element_type=jnp.float32)
    o_ref[...] = q_t + b4_ref[0, 0]


# ---------------------------------------------------------------------------
# Wrapper
# ---------------------------------------------------------------------------
def critic_forward(state, action, kernel_params, *, bf16_epilogue=None):
    """state: (B, S) f32, action: (B, A) f32 -> (B, 1) f32 Q-values."""
    (w1_s, w1_a, b1, w2, b2, w3, b3, w4t, b4) = kernel_params
    B, S = state.shape
    A = action.shape[1]
    H = w2.shape[0]
    if bf16_epilogue is None:
        bf16_epilogue = _default_bf16_epilogue()

    # Batch tile: large to amortize per-step overhead, 128-aligned for the lane-dense
    # output block.  If the whole batch fits in one tile, split into two so the
    # "parallel" grid axis can shard across v7x's two TensorCores.
    TM = min(2048, _round_up(B, 128))
    if B <= TM and TM > 256:
        TM = _round_up((TM + 1) // 2, 128)
    Bp = _round_up(B, TM)
    if Bp != B:
        pad = Bp - B
        state = jnp.pad(state, ((0, pad), (0, 0)))
        action = jnp.pad(action, ((0, pad), (0, 0)))

    grid = (Bp // TM,)
    batch_in = lambda shape: pl.BlockSpec(shape, lambda i: (i, 0))
    const = lambda shape: pl.BlockSpec(shape, lambda i: (0, 0))

    weight_bytes = ((S + A) * H + 2 * H * H + 8 * H) * 2 + 3 * H * 4 + 4
    flops = 2 * Bp * ((S + A) * H + 2 * H * H + 8 * H)
    bytes_accessed = Bp * (S + A) * 4 + weight_bytes + 8 * Bp * 4
    # Double-buffered in/out tiles + resident (double-buffered) weights + f32
    # activation slabs, with 2x headroom; clamped to stay v5e/v7x-safe.
    vmem_limit = int(min(max(2 * (2 * weight_bytes
                                  + 2 * TM * (S + A) * 4
                                  + 2 * 8 * TM * 4
                                  + 6 * TM * H * 4),
                             32 << 20), 64 << 20))

    out = pl.pallas_call(
        functools.partial(critic_kernel, bf16_epilogue=bf16_epilogue),
        out_shape=jax.ShapeDtypeStruct((8, Bp), jnp.float32),
        grid=grid,
        in_specs=[
            batch_in((TM, S)),        # state tile (f32; cast in-kernel)
            batch_in((TM, A)),        # action tile
            const((S, H)),            # W1_s (bf16)
            const((A, H)),            # W1_a (bf16)
            const((1, H)),            # b1   (f32)
            const((H, H)),            # W2   (bf16)
            const((1, H)),            # b2
            const((H, H)),            # W3   (bf16)
            const((1, H)),            # b3
            const((8, H)),            # W4^T padded to 8 rows (bf16)
            pl.BlockSpec(memory_space=pltpu.MemorySpace.SMEM),   # b4 scalar
        ],
        out_specs=pl.BlockSpec((8, TM), lambda i: (0, i)),
        compiler_params=pltpu.CompilerParams(
            dimension_semantics=("parallel",),
            vmem_limit_bytes=vmem_limit),
        cost_estimate=pl.CostEstimate(
            flops=flops, transcendentals=0, bytes_accessed=bytes_accessed),
    )(state, action, w1_s, w1_a, b1, w2, b2, w3, b3, w4t, b4)

    return out[0, :B][:, None]


# ---------------------------------------------------------------------------
# Parameters (PyTorch-style init, stored f32; packed to kernel layout)
# ---------------------------------------------------------------------------
def init_params(key, state_dim, action_dim, hidden_size):
    """U(-1/sqrt(fan_in), 1/sqrt(fan_in)); weights as (in, out), biases as (1, out)."""
    dims = [(state_dim + action_dim, hidden_size),
            (hidden_size, hidden_size),
            (hidden_size, hidden_size),
            (hidden_size, 1)]
    params = {}
    for n, (fan_in, fan_out) in zip("1234", dims):
        key, kw, kb = jax.random.split(key, 3)
        bound = 1.0 / float(fan_in) ** 0.5
        params["w" + n] = jax.random.uniform(kw, (fan_in, fan_out), jnp.float32,
                                             -bound, bound)
        params["b" + n] = jax.random.uniform(kb, (1, fan_out), jnp.float32,
                                             -bound, bound)
    return params


def pack_params(params, state_dim):
    """f32 module params -> kernel layout (split W1, bf16 weights, transposed layer 4)."""
    H = params["w1"].shape[1]
    w1_s = params["w1"][:state_dim].astype(jnp.bfloat16)
    w1_a = params["w1"][state_dim:].astype(jnp.bfloat16)
    b1 = params["b1"]
    w2 = params["w2"].astype(jnp.bfloat16)
    b2 = params["b2"]
    w3 = params["w3"].astype(jnp.bfloat16)
    b3 = params["b3"]
    # Layer 4 stored transposed + padded to 8 sublanes; only row 0 is real.
    w4t = jnp.zeros((8, H), jnp.float32).at[0, :].set(params["w4"][:, 0]).astype(jnp.bfloat16)
    b4 = params["b4"].reshape(1, 1)       # scalar bias -> SMEM
    return (w1_s, w1_a, b1, w2, b2, w3, b3, w4t, b4)


# ---------------------------------------------------------------------------
# References
# ---------------------------------------------------------------------------
def critic_reference_f32(state, action, params):
    """Pure-f32 reference (matches the PyTorch module exactly)."""
    x = jnp.concatenate([state, action], axis=1)
    x = jax.nn.relu(x @ params["w1"] + params["b1"])
    x = jax.nn.relu(x @ params["w2"] + params["b2"])
    x = jax.nn.relu(x @ params["w3"] + params["b3"])
    return x @ params["w4"] + params["b4"]


def critic_reference_kernel_numerics(state, action, params, bf16_epilogue):
    """Reference mirroring the kernel numerics (bf16 operands, f32 accum, epilogue mode)."""
    def mm(x, w):
        return jnp.dot(x.astype(jnp.bfloat16), w.astype(jnp.bfloat16),
                       preferred_element_type=jnp.float32)

    def act(acc, b):
        if bf16_epilogue:
            return jnp.maximum(acc.astype(jnp.bfloat16) + b.astype(jnp.bfloat16), 0)
        return jnp.maximum(acc + b, 0.0)

    x = jnp.concatenate([state, action], axis=1)
    h = act(mm(x, params["w1"]), params["b1"])
    h = act(mm(h, params["w2"]), params["b2"])
    h = act(mm(h, params["w3"]), params["b3"])
    return mm(h, params["w4"]) + params["b4"]


# ---------------------------------------------------------------------------
# Smoke test
# ---------------------------------------------------------------------------
if __name__ == "__main__":
    B, STATE_DIM, ACTION_DIM, HIDDEN = 8, 12, 4, 32

    key = jax.random.PRNGKey(0)
    k_state, k_action, k_params = jax.random.split(key, 3)

    state = jax.random.normal(k_state, (B, STATE_DIM), jnp.float32)
    action = jax.random.normal(k_action, (B, ACTION_DIM), jnp.float32)

    params = init_params(k_params, STATE_DIM, ACTION_DIM, HIDDEN)
    kernel_params = pack_params(params, STATE_DIM)

    bf16_epilogue = _default_bf16_epilogue()
    q = critic_forward(state, action, kernel_params, bf16_epilogue=bf16_epilogue)
    q = jax.block_until_ready(q)

    q_ref_kernel = critic_reference_kernel_numerics(state, action, params, bf16_epilogue)
    q_ref_f32 = critic_reference_f32(state, action, params)

    assert q.shape == (B, 1), f"bad output shape {q.shape}"
    assert bool(jnp.all(jnp.isfinite(q))), "non-finite output"
    # Same-numerics check (bf16 operands, f32 accumulation, same epilogue mode).
    assert jnp.allclose(q, q_ref_kernel, atol=5e-3, rtol=5e-3), "mismatch vs kernel-numerics ref"
    # Semantics check vs the full-f32 PyTorch-equivalent forward (bf16 rounding slack).
    assert jnp.allclose(q, q_ref_f32, atol=5e-2, rtol=5e-2), "mismatch vs f32 reference"

    print("KERNEL_OK")
</pallas_src>

<mosaic_0001>
module attributes {stable_mosaic.version = 11 : i64} {
  func.func @critic_kernel(%arg0: i32, %arg1: memref<128x12xf32, #tpu.memory_space<vmem>>, %arg2: memref<128x4xf32, #tpu.memory_space<vmem>>, %arg3: memref<12x32xbf16, #tpu.memory_space<vmem>>, %arg4: memref<4x32xbf16, #tpu.memory_space<vmem>>, %arg5: memref<1x32xf32, #tpu.memory_space<vmem>>, %arg6: memref<32x32xbf16, #tpu.memory_space<vmem>>, %arg7: memref<1x32xf32, #tpu.memory_space<vmem>>, %arg8: memref<32x32xbf16, #tpu.memory_space<vmem>>, %arg9: memref<1x32xf32, #tpu.memory_space<vmem>>, %arg10: memref<8x32xbf16, #tpu.memory_space<vmem>>, %arg11: memref<1x1xf32, #tpu.memory_space<smem>>, %arg12: memref<8x128xf32, #tpu.memory_space<vmem>>) attributes {dimension_semantics = [#tpu.dimension_semantics<parallel>], iteration_bounds = array<i64: 1>, scalar_prefetch = 0 : i64, scratch_operands = 0 : i64, tpu.core_type = #tpu.core_type<tc>, window_params = [{transform_indices = @transform_0, window_bounds = array<i64: 128, 12>}, {transform_indices = @transform_1, window_bounds = array<i64: 128, 4>}, {pipeline_mode = #tpu.pipeline_mode<synchronous>, transform_indices = @transform_2, window_bounds = array<i64: 12, 32>}, {pipeline_mode = #tpu.pipeline_mode<synchronous>, transform_indices = @transform_3, window_bounds = array<i64: 4, 32>}, {pipeline_mode = #tpu.pipeline_mode<synchronous>, transform_indices = @transform_4, window_bounds = array<i64: 1, 32>}, {pipeline_mode = #tpu.pipeline_mode<synchronous>, transform_indices = @transform_5, window_bounds = array<i64: 32, 32>}, {pipeline_mode = #tpu.pipeline_mode<synchronous>, transform_indices = @transform_6, window_bounds = array<i64: 1, 32>}, {pipeline_mode = #tpu.pipeline_mode<synchronous>, transform_indices = @transform_7, window_bounds = array<i64: 32, 32>}, {pipeline_mode = #tpu.pipeline_mode<synchronous>, transform_indices = @transform_8, window_bounds = array<i64: 1, 32>}, {pipeline_mode = #tpu.pipeline_mode<synchronous>, transform_indices = @transform_9, window_bounds = array<i64: 8, 32>}, {transform_indices = @transform_10, window_bounds = array<i64: 1, 1>}, {transform_indices = @transform_11, window_bounds = array<i64: 8, 128>}]} {
    %c0 = arith.constant 0 : index
    %c0_0 = arith.constant 0 : index
    %0 = vector.load %arg1[%c0, %c0_0] : memref<128x12xf32, #tpu.memory_space<vmem>>, vector<128x12xf32>
    %1 = arith.truncf %0 : vector<128x12xf32> to vector<128x12xbf16>
    %c0_1 = arith.constant 0 : index
    %c0_2 = arith.constant 0 : index
    %2 = vector.load %arg2[%c0_1, %c0_2] : memref<128x4xf32, #tpu.memory_space<vmem>>, vector<128x4xf32>
    %3 = arith.truncf %2 : vector<128x4xf32> to vector<128x4xbf16>
    %c0_3 = arith.constant 0 : index
    %c0_4 = arith.constant 0 : index
    %4 = vector.load %arg3[%c0_3, %c0_4] : memref<12x32xbf16, #tpu.memory_space<vmem>>, vector<12x32xbf16>
    %cst = arith.constant dense<0.000000e+00> : vector<128x32xf32>
    %5 = tpu.matmul %1, %4, %cst {dimension_numbers = #tpu.dot_dimension_numbers<[1], [0], [0], [1], [0, 0, 1, 1], [], []>} : vector<128x12xbf16>, vector<12x32xbf16>, vector<128x32xf32> -> vector<128x32xf32>
    %c0_5 = arith.constant 0 : index
    %c0_6 = arith.constant 0 : index
    %6 = vector.load %arg4[%c0_5, %c0_6] : memref<4x32xbf16, #tpu.memory_space<vmem>>, vector<4x32xbf16>
    %cst_7 = arith.constant dense<0.000000e+00> : vector<128x32xf32>
    %7 = tpu.matmul %3, %6, %cst_7 {dimension_numbers = #tpu.dot_dimension_numbers<[1], [0], [0], [1], [0, 0, 1, 1], [], []>} : vector<128x4xbf16>, vector<4x32xbf16>, vector<128x32xf32> -> vector<128x32xf32>
    %8 = arith.addf %5, %7 : vector<128x32xf32>
    %9 = arith.truncf %8 : vector<128x32xf32> to vector<128x32xbf16>
    %c0_8 = arith.constant 0 : index
    %c0_9 = arith.constant 0 : index
    %10 = vector.load %arg5[%c0_8, %c0_9] : memref<1x32xf32, #tpu.memory_space<vmem>>, vector<1x32xf32>
    %11 = arith.truncf %10 : vector<1x32xf32> to vector<1x32xbf16>
    %12 = vector.broadcast %11 : vector<1x32xbf16> to vector<128x32xbf16>
    %13 = arith.addf %9, %12 : vector<128x32xbf16>
    %cst_10 = arith.constant 0.000000e+00 : bf16
    %14 = vector.broadcast %cst_10 : bf16 to vector<128x32xbf16>
    %15 = arith.maximumf %13, %14 : vector<128x32xbf16>
    %c0_11 = arith.constant 0 : index
    %c0_12 = arith.constant 0 : index
    %16 = vector.load %arg6[%c0_11, %c0_12] : memref<32x32xbf16, #tpu.memory_space<vmem>>, vector<32x32xbf16>
    %cst_13 = arith.constant dense<0.000000e+00> : vector<128x32xf32>
    %17 = tpu.matmul %15, %16, %cst_13 {dimension_numbers = #tpu.dot_dimension_numbers<[1], [0], [0], [1], [0, 0, 1, 1], [], []>} : vector<128x32xbf16>, vector<32x32xbf16>, vector<128x32xf32> -> vector<128x32xf32>
    %18 = arith.truncf %17 : vector<128x32xf32> to vector<128x32xbf16>
    %c0_14 = arith.constant 0 : index
    %c0_15 = arith.constant 0 : index
    %19 = vector.load %arg7[%c0_14, %c0_15] : memref<1x32xf32, #tpu.memory_space<vmem>>, vector<1x32xf32>
    %20 = arith.truncf %19 : vector<1x32xf32> to vector<1x32xbf16>
    %21 = vector.broadcast %20 : vector<1x32xbf16> to vector<128x32xbf16>
    %22 = arith.addf %18, %21 : vector<128x32xbf16>
    %cst_16 = arith.constant 0.000000e+00 : bf16
    %23 = vector.broadcast %cst_16 : bf16 to vector<128x32xbf16>
    %24 = arith.maximumf %22, %23 : vector<128x32xbf16>
    %c0_17 = arith.constant 0 : index
    %c0_18 = arith.constant 0 : index
    %25 = vector.load %arg8[%c0_17, %c0_18] : memref<32x32xbf16, #tpu.memory_space<vmem>>, vector<32x32xbf16>
    %cst_19 = arith.constant dense<0.000000e+00> : vector<128x32xf32>
    %26 = tpu.matmul %24, %25, %cst_19 {dimension_numbers = #tpu.dot_dimension_numbers<[1], [0], [0], [1], [0, 0, 1, 1], [], []>} : vector<128x32xbf16>, vector<32x32xbf16>, vector<128x32xf32> -> vector<128x32xf32>
    %27 = arith.truncf %26 : vector<128x32xf32> to vector<128x32xbf16>
    %c0_20 = arith.constant 0 : index
    %c0_21 = arith.constant 0 : index
    %28 = vector.load %arg9[%c0_20, %c0_21] : memref<1x32xf32, #tpu.memory_space<vmem>>, vector<1x32xf32>
    %29 = arith.truncf %28 : vector<1x32xf32> to vector<1x32xbf16>
    %30 = vector.broadcast %29 : vector<1x32xbf16> to vector<128x32xbf16>
    %31 = arith.addf %27, %30 : vector<128x32xbf16>
    %cst_22 = arith.constant 0.000000e+00 : bf16
    %32 = vector.broadcast %cst_22 : bf16 to vector<128x32xbf16>
    %33 = arith.maximumf %31, %32 : vector<128x32xbf16>
    %c0_23 = arith.constant 0 : index
    %c0_24 = arith.constant 0 : index
    %34 = vector.load %arg10[%c0_23, %c0_24] : memref<8x32xbf16, #tpu.memory_space<vmem>>, vector<8x32xbf16>
    %cst_25 = arith.constant dense<0.000000e+00> : vector<8x128xf32>
    %35 = tpu.matmul %34, %33, %cst_25 {dimension_numbers = #tpu.dot_dimension_numbers<[1], [1], [0], [0], [0, 0, 1, 0], [], []>} : vector<8x32xbf16>, vector<128x32xbf16>, vector<8x128xf32> -> vector<8x128xf32>
    %c0_26 = arith.constant 0 : index
    %c0_27 = arith.constant 0 : index
    %36 = memref.load %arg11[%c0_26, %c0_27] : memref<1x1xf32, #tpu.memory_space<smem>>
    %37 = vector.broadcast %36 : f32 to vector<8x128xf32>
    %38 = arith.addf %35, %37 : vector<8x128xf32>
    %c0_28 = arith.constant 0 : index
    %c0_29 = arith.constant 0 : index
    %39 = vector.load %arg12[%c0_28, %c0_29] : memref<8x128xf32, #tpu.memory_space<vmem>>, vector<8x128xf32>
    tpu.vector_store %arg12[%c0_28, %c0_29], %38 {strides = array<i32>} : memref<8x128xf32, #tpu.memory_space<vmem>>, vector<8x128xf32>,
    return
  }
  func.func @transform_0(%arg0: i32) -> (i32, i32) {
    %c0_i32 = arith.constant 0 : i32
    %c0_i32_0 = arith.constant 0 : i32
    return %arg0, %c0_i32 : i32, i32
  }
  func.func @transform_1(%arg0: i32) -> (i32, i32) {
    %c0_i32 = arith.constant 0 : i32
    %c0_i32_0 = arith.constant 0 : i32
    return %arg0, %c0_i32 : i32, i32
  }
  func.func @transform_2(%arg0: i32) -> (i32, i32) {
    %c0_i32 = arith.constant 0 : i32
    %c0_i32_0 = arith.constant 0 : i32
    %c0_i32_1 = arith.constant 0 : i32
    return %c0_i32, %c0_i32_0 : i32, i32
  }
  func.func @transform_3(%arg0: i32) -> (i32, i32) {
    %c0_i32 = arith.constant 0 : i32
    %c0_i32_0 = arith.constant 0 : i32
    %c0_i32_1 = arith.constant 0 : i32
    return %c0_i32, %c0_i32_0 : i32, i32
  }
  func.func @transform_4(%arg0: i32) -> (i32, i32) {
    %c0_i32 = arith.constant 0 : i32
    %c0_i32_0 = arith.constant 0 : i32
    %c0_i32_1 = arith.constant 0 : i32
    return %c0_i32, %c0_i32_0 : i32, i32
  }
  func.func @transform_5(%arg0: i32) -> (i32, i32) {
    %c0_i32 = arith.constant 0 : i32
    %c0_i32_0 = arith.constant 0 : i32
    %c0_i32_1 = arith.constant 0 : i32
    return %c0_i32, %c0_i32_0 : i32, i32
  }
  func.func @transform_6(%arg0: i32) -> (i32, i32) {
    %c0_i32 = arith.constant 0 : i32
    %c0_i32_0 = arith.constant 0 : i32
    %c0_i32_1 = arith.constant 0 : i32
    return %c0_i32, %c0_i32_0 : i32, i32
  }
  func.func @transform_7(%arg0: i32) -> (i32, i32) {
    %c0_i32 = arith.constant 0 : i32
    %c0_i32_0 = arith.constant 0 : i32
    %c0_i32_1 = arith.constant 0 : i32
    return %c0_i32, %c0_i32_0 : i32, i32
  }
  func.func @transform_8(%arg0: i32) -> (i32, i32) {
    %c0_i32 = arith.constant 0 : i32
    %c0_i32_0 = arith.constant 0 : i32
    %c0_i32_1 = arith.constant 0 : i32
    return %c0_i32, %c0_i32_0 : i32, i32
  }
  func.func @transform_9(%arg0: i32) -> (i32, i32) {
    %c0_i32 = arith.constant 0 : i32
    %c0_i32_0 = arith.constant 0 : i32
    %c0_i32_1 = arith.constant 0 : i32
    return %c0_i32, %c0_i32_0 : i32, i32
  }
  func.func @transform_10(%arg0: i32) -> (i32, i32) {
    %c0_i32 = arith.constant 0 : i32
    %c0_i32_0 = arith.constant 0 : i32
    %c0_i32_1 = arith.constant 0 : i32
    return %c0_i32, %c0_i32_0 : i32, i32
  }
  func.func @transform_11(%arg0: i32) -> (i32, i32) {
    %c0_i32 = arith.constant 0 : i32
    %c0_i32_0 = arith.constant 0 : i32
    return %c0_i32, %arg0 : i32, i32
  }
}

</mosaic_0001>

<bundles_post_ra>
// kernel: tpu_custom_call.1
= control target key start
LH: loop header
LB: loop body
LE: loop exit
PB: predicated region body
PF: predicated region fallthrough
CT: control target
= control target key end

     0   :  { %vm117_vm0 = vcmask 1041408   ;;  %vm92_vm1 = vcmask 31744   ;;  %vm248_vm2 = vcmask 1045504   ;;  %s1309_s0 = inlined_call_operand.vmem [shape: f32[128,12], index: 0, kind: input, shape index: {}]   ;;  %s1310_s1 = inlined_call_operand.vmem [shape: f32[128,4], index: 1, kind: input, shape index: {}]   ;;  %s1311_s2 = inlined_call_operand.vmem [shape: bf16[12,32], index: 2, kind: input, shape index: {}]   ;;  %s1312_s3 = inlined_call_operand.vmem [shape: bf16[4,32], index: 3, kind: input, shape index: {}]   ;;  %s1313_s4 = inlined_call_operand.vmem [shape: f32[1,32], index: 4, kind: input, shape index: {}]   ;;  %s1314_s5 = inlined_call_operand.vmem [shape: bf16[32,32], index: 5, kind: input, shape index: {}]   ;;  %s1315_s6 = inlined_call_operand.vmem [shape: f32[1,32], index: 6, kind: input, shape index: {}]   ;;  %s1316_s7 = inlined_call_operand.vmem [shape: bf16[32,32], index: 7, kind: input, shape index: {}]   ;;  %s1317_s8 = inlined_call_operand.vmem [shape: f32[1,32], index: 8, kind: input, shape index: {}]   ;;  %s1318_s9 = inlined_call_operand.vmem [shape: bf16[8,32], index: 9, kind: input, shape index: {}]   ;;  %s1319_s10 = inlined_call_operand.<no memory space> [shape: f32[1,1], index: 10, kind: input, shape index: {}]   ;;  %s1320_s11 = inlined_call_operand.hbm [shape: f32[8,128], index: 11, kind: output, shape index: {}]  }
   0x1   :  { %v91_v0 = vld [vmem:[%s1312_s3] sm:$0x3]  ;;  %v70_v2 = vld [vmem:[%s1310_s1 + $0x28] sm:$0xff]  ;;  %v71_v5 = vld [vmem:[%s1310_s1 + $0x30] sm:$0xff] }
   0x2   :  { %v69_v1 = vld [vmem:[%s1310_s1 + $0x20] sm:$0xff]  ;;  %992 = vmatprep.subr.msk.bf16.mxu1 %vm117_vm0, %v91_v0  ;;  %v119_v3 = vsel %vm117_vm0, %v91_v0, 0  ;;  %v72_v6 = vld [vmem:[%s1310_s1 + $0x38] sm:$0xff]  ;;  %991 = vmatprep.subr.msk.bf16.mxu0 %vm117_vm0, %v91_v0  ;;  %v74_v10 = vld [vmem:[%s1310_s1 + $0x48] sm:$0xff] }
   0x3   :  { %v83_v4 = vpack.c.bf16 %v70_v2, %v69_v1  ;;  %990 = vmatpush3.bf16.msra.mxu1 %v119_v3  ;;  %v84_v7 = vpack.c.bf16 %v72_v6, %v71_v5  ;;  %v998_v8 = vld [vmem:[%s1311_s2] sm:$0x3f]   ;;  %894 = vmatpush3.bf16.msra.mxu0 %v119_v3  ;;  %v75_v13 = vld [vmem:[%s1310_s1 + $0x50] sm:$0xff]  ;;  %v66_v15 = vld [vmem:[%s1310_s1 + $0x8] sm:$0xff] }
   0x4   :  { %v73_v9 = vld [vmem:[%s1310_s1 + $0x40] sm:$0xff]  ;;  %993 = vmatprep.subr.msk.bf16.mxu1 %vm248_vm2, %v998_v8  ;;  %v250_v11 = vsel %vm248_vm2, %v998_v8, 0  ;;  %v76_v16 = vld [vmem:[%s1310_s1 + $0x58] sm:$0xff]  ;;  %v67_v18 = vld [vmem:[%s1310_s1 + $0x10] sm:$0xff] }
   0x5   :  { %899 = vmatprep.mubr.msk.bf16.mxu1 %vm92_vm1, %v83_v4  ;;  %v85_v12 = vpack.c.bf16 %v74_v10, %v73_v9  ;;  %v65_v14 = vld [vmem:[%s1310_s1] sm:$0xff]  ;;  %v68_v19 = vld [vmem:[%s1310_s1 + $0x18] sm:$0xff]  ;;  %v78_v21 = vld [vmem:[%s1310_s1 + $0x68] sm:$0xff]  ;;  %v86_v23 = vpack.c.bf16 %v76_v16, %v75_v13 }
   0x6   :  { %900 = vmatmul.mubr.msk.bf16.vlgmr.msra.gmra.mxu1 %vm92_vm1, %v84_v7  ;;  %v81_v17 = vpack.c.bf16 %v66_v15, %v65_v14  ;;  %v77_v20 = vld [vmem:[%s1310_s1 + $0x60] sm:$0xff]  ;;  %v82_v22 = vpack.c.bf16 %v68_v19, %v67_v18  ;;  %v79_v25 = vld [vmem:[%s1310_s1 + $0x70] sm:$0xff]  ;;  %v80_v26 = vld [vmem:[%s1310_s1 + $0x78] sm:$0xff] }
   0x7   :  { %912 = vmatpush3.bf16.msra.mxu1 %v250_v11  ;;  %903 = vmatprep.mubr.msk.bf16.mxu1 %vm92_vm1, %v85_v12  ;;  %v87_v24 = vpack.c.bf16 %v78_v21, %v77_v20 }
   0x8   :  { %895 = vmatprep.mubr.msk.bf16.mxu0 %vm92_vm1, %v81_v17 }
   0x9   :  { %896 = vmatmul.mubr.msk.bf16.vlgmr.msra.gmra.mxu0 %vm92_vm1, %v82_v22 }
   0xe   :  { %904 = vmatmul.mubr.msk.bf16.gmra.mxu1 %vm92_vm1, %v86_v23 }
   0xf   :  { %907 = vmatprep.mubr.msk.bf16.mxu1 %vm92_vm1, %v87_v24 }
  0x10   :  { %17 = vsyncpa [#allocation4], 0  ;;  %v41_v27 = vld [vmem:[%s1309_s0] sm:$0xff]  ;;  %v42_v28 = vld [vmem:[%s1309_s0 + $0x8] sm:$0xff]  ;;  %v88_v29 = vpack.c.bf16 %v80_v26, %v79_v25  ;;  %vm223_vm3 = vcmask 97280   ;;  %v362_v3 = vlaneseq  ;;  %vm398_vm4 = vcmask 261120  }
  0x11   :  { %v57_v30 = vpack.c.bf16 %v42_v28, %v41_v27  ;;  %v43_v31 = vld [vmem:[%s1309_s0 + $0x10] sm:$0xff]  ;;  %v44_v32 = vld [vmem:[%s1309_s0 + $0x18] sm:$0xff]  ;;  %v45_v33 = vld [vmem:[%s1309_s0 + $0x20] sm:$0xff]  ;;  %vm1027_vm5 = vmmov 0   ;;  %s1028_s12 = smov [#allocation3]  }
  0x12   :  { %v46_v34 = vld [vmem:[%s1309_s0 + $0x28] sm:$0xff]  ;;  %v58_v35 = vpack.c.bf16 %v44_v32, %v43_v31  ;;  %v47_v37 = vld [vmem:[%s1309_s0 + $0x30] sm:$0xff]  ;;  %v48_v38 = vld [vmem:[%s1309_s0 + $0x38] sm:$0xff]  ;;  %v363_v9 = vshrl.u32 %v362_v3, 7  ;;  %s800_s13 = sshll.u32 %s1028_s12, 4  ;;  %s801_s13 = int_to_ptr.vmem [resolvable:$true] %s800_s13 }
  0x13   :  { %v59_v36 = vpack.c.bf16 %v46_v34, %v45_v33  ;;  %v49_v39 = vld [vmem:[%s1309_s0 + $0x40] sm:$0xff]  ;;  %v50_v40 = vld [vmem:[%s1309_s0 + $0x48] sm:$0xff]  ;;  %v60_v41 = vpack.c.bf16 %v48_v38, %v47_v37  ;;  %v51_v43 = vld [vmem:[%s1309_s0 + $0x50] sm:$0xff]  ;;  %s1003_s14 = scalar_lea.vmem %s801_s13, 128  ;;  %p1008_p1 = scmp.lt.s32.totalorder %s801_s13, %s801_s13 }
  0x14   :  { %v61_v42 = vpack.c.bf16 %v50_v40, %v49_v39  ;;  %v52_v44 = vld [vmem:[%s1309_s0 + $0x58] sm:$0xff]  ;;  %v53_v45 = vld [vmem:[%s1309_s0 + $0x60] sm:$0xff]  ;;  %v54_v46 = vld [vmem:[%s1309_s0 + $0x68] sm:$0xff]  ;;  %v1228_v14 = vsub.s32 0, %v363_v9  ;;  %p1004_p0 = scmp.ne.s32.totalorder %s801_s13, %s1003_s14  ;;  %p1009_p2 = scmp.lt.s32.totalorder %s1003_s14, %s1003_s14 }
  0x15   :  { %v62_v47 = vpack.c.bf16 %v52_v44, %v51_v43  ;;  %v63_v48 = vpack.c.bf16 %v54_v46, %v53_v45  ;;  %v55_v49 = vld [vmem:[%s1309_s0 + $0x70] sm:$0xff]  ;;  %v56_v50 = vld [vmem:[%s1309_s0 + $0x78] sm:$0xff]  ;;  %v999_v52 = vld [vmem:[%s1314_s5 + $0x8] sm:$0xff]  }
  0x16   :  { %908 = vmatmul.mubr.msk.bf16.gmra.mxu1 %vm92_vm1, %v88_v29  ;;  %v64_v51 = vpack.c.bf16 %v56_v50, %v55_v49  ;;  %929 = vmatprep.subr.bf16.mxu0 %v999_v52  ;;  %v1000_v53 = vld [vmem:[%s1314_s5] sm:$0xff]   ;;  %v1001_v54 = vld [vmem:[%s1316_s7 + $0x8] sm:$0xff]   ;;  %p1010_p3 = por %p1009_p2, %p1008_p1 }
  0x17   :  { %913 = vmatprep.mubr.msk.bf16.mxu1 %vm223_vm3, %v57_v30  ;;  %930 = vmatpush3.bf16.msra.mxu0 %v999_v52  ;;  %v1002_v55 = vld [vmem:[%s1316_s7] sm:$0xff]   ;;  %v1025_v30 = vmov 0  }
  0x18   :  { %931 = vmatprep.subr.bf16.mxu0 %v1000_v53  ;;  %949 = vmatprep.subr.bf16.mxu1 %v1001_v54  ;;  %v357_v4 = vld [vmem:[%s1313_s4] sm:$0x1]  ;;  %p1011_p4 = pnand %p1010_p3, %p1004_p0 }
  0x19   :  { %v358_v8 = vpack.c.bf16 %v357_v4, %v357_v4 }
  0x1b   :  { %932 = vmatpush3.bf16.msra.mxu0 %v1000_v53  ;;  %v360_v13 = vpack.i.b16 %v358_v8, %v358_v8 }
  0x1d   :  { %v365_v19 = vrot.slane %v360_v13, %v1228_v14 }
  0x1e   :  { %914 = vmatmul.mubr.msk.bf16.vlgmr.msra.gmra.mxu1 %vm223_vm3, %v58_v35 }
  0x1f   :  { %917 = vmatprep.mubr.msk.bf16.mxu1 %vm223_vm3, %v59_v36  ;;  %950 = vmatpush3.bf16.msra.mxu1 %v1001_v54 }
  0x20   :  { %951 = vmatprep.subr.bf16.mxu1 %v1002_v55 }
  0x23   :  { %952 = vmatpush3.bf16.msra.mxu1 %v1002_v55 }
  0x26   :  { %918 = vmatmul.mubr.msk.bf16.gmra.mxu1 %vm223_vm3, %v60_v41 }
  0x27   :  { %921 = vmatprep.mubr.msk.bf16.mxu1 %vm223_vm3, %v61_v42 }
  0x2e   :  { %922 = vmatmul.mubr.msk.bf16.gmra.mxu1 %vm223_vm3, %v62_v47 }
  0x2f   :  { %925 = vmatprep.mubr.msk.bf16.mxu1 %vm223_vm3, %v63_v48 }
  0x36   :  { %926 = vmatmul.mubr.msk.bf16.gmra.mxu1 %vm223_vm3, %v64_v51 }
  0xc6   :  { %v901_v56 = vpop.f32.mrf.mxu1 }
  0xc8   :  { %v171_v57 = vpop.f32.mrf.mxu1 }
  0xc9   :  { %v897_v2 = vpop.f32.mrf.mxu0 }
  0xca   :  { %v902_v58 = vpop.f32.mrf.mxu1 }
  0xcb   :  { %v155_v6 = vpop.f32.mrf.mxu0 }
  0xcc   :  { %v174_v59 = vpop.f32.mrf.mxu1 }
  0xcd   :  { %v898_v11 = vpop.f32.mrf.mxu0 }
  0xce   :  { %v905_v60 = vpop.f32.mrf.mxu1 }
  0xcf   :  { %v158_v18 = vpop.f32.mrf.mxu0 }
  0xd0   :  { %v187_v61 = vpop.f32.mrf.mxu1 }
  0xd2   :  { %v906_v62 = vpop.f32.mrf.mxu1 }
  0xd4   :  { %v190_v63 = vpop.f32.mrf.mxu1 }
  0xd6   :  { %v1219_v0 = vpop.f32.mrf.mxu1 }
  0xd8   :  { %v1221_v1 = vpop.f32.mrf.mxu1 }
  0xda   :  { %v910_v5 = vpop.f32.mrf.mxu1 }
  0xdc   :  { %v1226_v7 = vpop.f32.mrf.mxu1 }
  0xde   :  { %v915_v10 = vpop.f32.mrf.mxu1 }
  0xdf   :  { %v295_v16 = vadd.f32 %v915_v10, %v897_v2 }
  0xe0   :  { %v286_v12 = vpop.f32.mrf.mxu1 }
  0xe1   :  { %v287_v21 = vadd.f32 %v286_v12, %v155_v6 }
  0xe2   :  { %v916_v15 = vpop.f32.mrf.mxu1 }
  0xe3   :  { %v298_v17 = vadd.f32 %v916_v15, %v898_v11 }
  0xe4   :  { %v289_v20 = vpop.f32.mrf.mxu1 }
  0xe5   :  { %v350_v22 = vpack.c.bf16 %v298_v17, %v295_v16  ;;  %v290_v23 = vadd.f32 %v289_v20, %v158_v18 }
  0xe6   :  { %v919_v24 = vpop.f32.mrf.mxu1 }
  0xe7   :  { %v349_v25 = vpack.c.bf16 %v290_v23, %v287_v21  ;;  %v367_v26 = vadd.bf16 %v365_v19, %v350_v22  ;;  %v311_v32 = vadd.f32 %v919_v24, %v901_v56 }
  0xe8   :  { %v302_v27 = vpop.f32.mrf.mxu1 }
  0xe9   :  { %v366_v28 = vadd.bf16 %v365_v19, %v349_v25  ;;  %v375_v34 = vmax.bf16 %v1025_v30, %v367_v26  ;;  %v303_v36 = vadd.f32 %v302_v27, %v171_v57 }
  0xea   :  { %v920_v29 = vpop.f32.mrf.mxu1 }
  0xeb   :  { %v374_v31 = vmax.bf16 %v1025_v30, %v366_v28  ;;  %v314_v33 = vadd.f32 %v920_v29, %v902_v58 }
  0xec   :  { %v305_v35 = vpop.f32.mrf.mxu1 }
  0xed   :  { %v352_v37 = vpack.c.bf16 %v314_v33, %v311_v32  ;;  %v306_v38 = vadd.f32 %v305_v35, %v174_v59  ;;  %933 = vmatprep.mubr.msk.bf16.mxu0 %vm398_vm4, %v374_v31 }
  0xee   :  { %v923_v39 = vpop.f32.mrf.mxu1  ;;  %934 = vmatmul.mubr.msk.bf16.vlgmr.msra.gmra.mxu0 %vm398_vm4, %v375_v34 }
  0xef   :  { %v351_v40 = vpack.c.bf16 %v306_v38, %v303_v36  ;;  %v369_v41 = vadd.bf16 %v365_v19, %v352_v37  ;;  %v327_v46 = vadd.f32 %v923_v39, %v905_v60 }
  0xf0   :  { %v318_v42 = vpop.f32.mrf.mxu1 }
  0xf1   :  { %v368_v43 = vadd.bf16 %v365_v19, %v351_v40  ;;  %v377_v48 = vmax.bf16 %v1025_v30, %v369_v41  ;;  %v319_v50 = vadd.f32 %v318_v42, %v187_v61 }
  0xf2   :  { %v924_v44 = vpop.f32.mrf.mxu1 }
  0xf3   :  { %v376_v45 = vmax.bf16 %v1025_v30, %v368_v43  ;;  %v330_v47 = vadd.f32 %v924_v44, %v906_v62 }
  0xf4   :  { %v321_v49 = vpop.f32.mrf.mxu1 }
  0xf5   :  { %v354_v51 = vpack.c.bf16 %v330_v47, %v327_v46  ;;  %v322_v52 = vadd.f32 %v321_v49, %v190_v63  ;;  %937 = vmatprep.mubr.msk.bf16.mxu0 %vm398_vm4, %v376_v45 }
  0xf6   :  { %v927_v53 = vpop.f32.mrf.mxu1  ;;  %938 = vmatmul.mubr.msk.bf16.gmra.mxu0 %vm398_vm4, %v377_v48 }
  0xf7   :  { %v353_v54 = vpack.c.bf16 %v322_v52, %v319_v50  ;;  %v371_v55 = vadd.bf16 %v365_v19, %v354_v51  ;;  %v343_v60 = vadd.f32 %v927_v53, %v1219_v0 }
  0xf8   :  { %v334_v56 = vpop.f32.mrf.mxu1 }
  0xf9   :  { %v370_v57 = vadd.bf16 %v365_v19, %v353_v54  ;;  %v379_v2 = vmax.bf16 %v1025_v30, %v371_v55  ;;  %v335_v63 = vadd.f32 %v334_v56, %v1221_v1  ;;  %v528_v1 = vld [vmem:[%s1315_s6] sm:$0x1]  ;;  %v1026_v54 = vmov 0.0  }
  0xfa   :  { %v928_v58 = vpop.f32.mrf.mxu1  ;;  %969 = vmatprep.subr.bf16.mxu0 %v1026_v54 }
  0xfb   :  { %v378_v59 = vmax.bf16 %v1025_v30, %v370_v57  ;;  %v346_v62 = vadd.f32 %v928_v58, %v910_v5  ;;  %v529_v5 = vpack.c.bf16 %v528_v1, %v528_v1 }
  0xfc   :  { %v337_v61 = vpop.f32.mrf.mxu1 }
  0xfd   :  { %v356_v3 = vpack.c.bf16 %v346_v62, %v343_v60  ;;  %v338_v4 = vadd.f32 %v337_v61, %v1226_v7  ;;  %941 = vmatprep.mubr.msk.bf16.mxu0 %vm398_vm4, %v378_v59  ;;  %v531_v11 = vpack.i.b16 %v529_v5, %v529_v5 }
  0xfe   :  { %942 = vmatmul.mubr.msk.bf16.gmra.mxu0 %vm398_vm4, %v379_v2 }
  0xff   :  { %v355_v6 = vpack.c.bf16 %v338_v4, %v335_v63  ;;  %v373_v8 = vadd.bf16 %v365_v19, %v356_v3  ;;  %v536_v15 = vrot.slane %v531_v11, %v1228_v14  ;;  %v698_v4 = vld [vmem:[%s1317_s8] sm:$0x1] }
 0x101   :  { %v372_v9 = vadd.bf16 %v365_v19, %v355_v6  ;;  %v381_v0 = vmax.bf16 %v1025_v30, %v373_v8 }
 0x103   :  { %v380_v10 = vmax.bf16 %v1025_v30, %v372_v9  ;;  %v699_v9 = vpack.c.bf16 %v698_v4, %v698_v4 }
 0x105   :  { %945 = vmatprep.mubr.msk.bf16.mxu0 %vm398_vm4, %v380_v10  ;;  %v701_v1 = vpack.i.b16 %v699_v9, %v699_v9 }
 0x106   :  { %946 = vmatmul.mubr.msk.bf16.gmra.mxu0 %vm398_vm4, %v381_v0 }
 0x107   :  { %985 = vmatprep.mubr.msk.bf16.mxu0 %vm1027_vm5, %v1026_v54  ;;  %v706_v11 = vrot.slane %v701_v1, %v1228_v14 }
 0x1ae   :  { %v935_v7 = vpop.f32.mrf.mxu0 }
 0x1b0   :  { %v457_v12 = vpop.f32.mrf.mxu0 }
 0x1b2   :  { %v936_v13 = vpop.f32.mrf.mxu0 }
 0x1b3   :  { %v521_v16 = vpack.c.bf16 %v936_v13, %v935_v7 }
 0x1b4   :  { %v460_v17 = vpop.f32.mrf.mxu0 }
 0x1b5   :  { %v520_v18 = vpack.c.bf16 %v460_v17, %v457_v12  ;;  %v538_v19 = vadd.bf16 %v536_v15, %v521_v16 }
 0x1b6   :  { %v939_v20 = vpop.f32.mrf.mxu0 }
 0x1b7   :  { %v537_v21 = vadd.bf16 %v536_v15, %v520_v18  ;;  %v546_v24 = vmax.bf16 %v1025_v30, %v538_v19 }
 0x1b8   :  { %v473_v22 = vpop.f32.mrf.mxu0 }
 0x1b9   :  { %v545_v23 = vmax.bf16 %v1025_v30, %v537_v21 }
 0x1ba   :  { %v940_v25 = vpop.f32.mrf.mxu0 }
 0x1bb   :  { %v523_v26 = vpack.c.bf16 %v940_v25, %v939_v20  ;;  %953 = vmatprep.mubr.msk.bf16.mxu1 %vm398_vm4, %v545_v23 }
 0x1bc   :  { %v476_v27 = vpop.f32.mrf.mxu0  ;;  %954 = vmatmul.mubr.msk.bf16.vlgmr.msra.gmra.mxu1 %vm398_vm4, %v546_v24 }
 0x1bd   :  { %v522_v28 = vpack.c.bf16 %v476_v27, %v473_v22  ;;  %v540_v29 = vadd.bf16 %v536_v15, %v523_v26 }
 0x1be   :  { %v943_v31 = vpop.f32.mrf.mxu0 }
 0x1bf   :  { %v539_v32 = vadd.bf16 %v536_v15, %v522_v28  ;;  %v548_v35 = vmax.bf16 %v1025_v30, %v540_v29 }
 0x1c0   :  { %v489_v33 = vpop.f32.mrf.mxu0 }
 0x1c1   :  { %v547_v34 = vmax.bf16 %v1025_v30, %v539_v32 }
 0x1c2   :  { %v944_v36 = vpop.f32.mrf.mxu0 }
 0x1c3   :  { %v525_v37 = vpack.c.bf16 %v944_v36, %v943_v31  ;;  %957 = vmatprep.mubr.msk.bf16.mxu1 %vm398_vm4, %v547_v34 }
 0x1c4   :  { %v492_v38 = vpop.f32.mrf.mxu0  ;;  %958 = vmatmul.mubr.msk.bf16.gmra.mxu1 %vm398_vm4, %v548_v35 }
 0x1c5   :  { %v524_v39 = vpack.c.bf16 %v492_v38, %v489_v33  ;;  %v542_v40 = vadd.bf16 %v536_v15, %v525_v37 }
 0x1c6   :  { %v947_v41 = vpop.f32.mrf.mxu0 }
 0x1c7   :  { %v541_v42 = vadd.bf16 %v536_v15, %v524_v39  ;;  %v550_v45 = vmax.bf16 %v1025_v30, %v542_v40 }
 0x1c8   :  { %v505_v43 = vpop.f32.mrf.mxu0 }
 0x1c9   :  { %v549_v44 = vmax.bf16 %v1025_v30, %v541_v42 }
 0x1ca   :  { %v948_v46 = vpop.f32.mrf.mxu0 }
 0x1cb   :  { %v527_v47 = vpack.c.bf16 %v948_v46, %v947_v41  ;;  %961 = vmatprep.mubr.msk.bf16.mxu1 %vm398_vm4, %v549_v44  ;;  %v723_v44 = vld [vmem:[%s1318_s9] sm:$0xf] }
 0x1cc   :  { %v508_v48 = vpop.f32.mrf.mxu0  ;;  %962 = vmatmul.mubr.msk.bf16.gmra.mxu1 %vm398_vm4, %v550_v45  ;;  %v725_v45 = vstv %s1319_s10 }
 0x1cd   :  { %v526_v49 = vpack.c.bf16 %v508_v48, %v505_v43  ;;  %v544_v50 = vadd.bf16 %v536_v15, %v527_v47 }
 0x1cf   :  { %v543_v51 = vadd.bf16 %v536_v15, %v526_v49  ;;  %v552_v53 = vmax.bf16 %v1025_v30, %v544_v50 }
 0x1d1   :  { %v551_v52 = vmax.bf16 %v1025_v30, %v543_v51 }
 0x1d3   :  { %965 = vmatprep.mubr.msk.bf16.mxu1 %vm398_vm4, %v551_v52 }
 0x1d4   :  { %966 = vmatmul.mubr.msk.bf16.gmra.mxu1 %vm398_vm4, %v552_v53 }
 0x27c   :  { %v955_v55 = vpop.f32.mrf.mxu1 }
 0x27e   :  { %v627_v56 = vpop.f32.mrf.mxu1 }
 0x280   :  { %v956_v57 = vpop.f32.mrf.mxu1 }
 0x281   :  { %v691_v58 = vpack.c.bf16 %v956_v57, %v955_v55 }
 0x282   :  { %v630_v59 = vpop.f32.mrf.mxu1 }
 0x283   :  { %v690_v60 = vpack.c.bf16 %v630_v59, %v627_v56  ;;  %v708_v37 = vadd.bf16 %v706_v11, %v691_v58 }
 0x284   :  { %v959_v62 = vpop.f32.mrf.mxu1 }
 0x285   :  { %v716_v39 = vmax.bf16 %v1025_v30, %v708_v37  ;;  %v707_v40 = vadd.bf16 %v706_v11, %v690_v60 }
 0x286   :  { %v643_v2 = vpop.f32.mrf.mxu1 }
 0x287   :  { %v733_v41 = vsel %vm398_vm4, %v716_v39, 0  ;;  %v715_v42 = vmax.bf16 %v1025_v30, %v707_v40 }
 0x288   :  { %v960_v61 = vpop.f32.mrf.mxu1 }
 0x289   :  { %v693_v27 = vpack.c.bf16 %v960_v61, %v959_v62  ;;  %v730_v43 = vsel %vm398_vm4, %v715_v42, 0 }
 0x28a   :  { %v646_v63 = vpop.f32.mrf.mxu1 }
 0x28b   :  { %v710_v29 = vadd.bf16 %v706_v11, %v693_v27  ;;  %v692_v33 = vpack.c.bf16 %v646_v63, %v643_v2 }
 0x28c   :  { %v963_v3 = vpop.f32.mrf.mxu1 }
 0x28d   :  { %v718_v32 = vmax.bf16 %v1025_v30, %v710_v29  ;;  %v709_v34 = vadd.bf16 %v706_v11, %v692_v33 }
 0x28e   :  { %v659_v6 = vpop.f32.mrf.mxu1 }
 0x28f   :  { %v739_v35 = vsel %vm398_vm4, %v718_v32, 0  ;;  %v717_v36 = vmax.bf16 %v1025_v30, %v709_v34 }
 0x290   :  { %v964_v8 = vpop.f32.mrf.mxu1 }
 0x291   :  { %v695_v20 = vpack.c.bf16 %v964_v8, %v963_v3  ;;  %v736_v38 = vsel %vm398_vm4, %v717_v36, 0 }
 0x292   :  { %v662_v10 = vpop.f32.mrf.mxu1 }
 0x293   :  { %v712_v22 = vadd.bf16 %v706_v11, %v695_v20  ;;  %v694_v24 = vpack.c.bf16 %v662_v10, %v659_v6 }
 0x294   :  { %v967_v0 = vpop.f32.mrf.mxu1 }
 0x295   :  { %v720_v14 = vmax.bf16 %v1025_v30, %v712_v22  ;;  %v711_v25 = vadd.bf16 %v706_v11, %v694_v24 }
 0x296   :  { %v675_v5 = vpop.f32.mrf.mxu1 }
 0x297   :  { %v745_v26 = vsel %vm398_vm4, %v720_v14, 0  ;;  %v719_v28 = vmax.bf16 %v1025_v30, %v711_v25 }
 0x298   :  { %v968_v7 = vpop.f32.mrf.mxu1 }
 0x299   :  { %v697_v12 = vpack.c.bf16 %v968_v7, %v967_v0  ;;  %v742_v31 = vsel %vm398_vm4, %v719_v28, 0 }
 0x29a   :  { %v678_v13 = vpop.f32.mrf.mxu1 }
 0x29b   :  { %v714_v15 = vadd.bf16 %v706_v11, %v697_v12  ;;  %v696_v16 = vpack.c.bf16 %v678_v13, %v675_v5 }
 0x29d   :  { %v722_v17 = vmax.bf16 %v1025_v30, %v714_v15  ;;  %v713_v18 = vadd.bf16 %v706_v11, %v696_v16 }
 0x29f   :  { %v751_v19 = vsel %vm398_vm4, %v722_v17, 0  ;;  %v721_v21 = vmax.bf16 %v1025_v30, %v713_v18 }
 0x2a0   :  { %970 = vmatpush3.bf16.xpose.msra.mxu0 %v751_v19 }
 0x2a1   :  { %971 = vmatprep.subr.bf16.mxu0 %v1026_v54  ;;  %v748_v23 = vsel %vm398_vm4, %v721_v21, 0 }
 0x2a8   :  { %972 = vmatpush3.bf16.xpose.msra.mxu0 %v748_v23 }
 0x2a9   :  { %973 = vmatprep.subr.bf16.mxu0 %v1026_v54 }
 0x2b0   :  { %974 = vmatpush3.bf16.xpose.msra.mxu0 %v745_v26 }
 0x2b1   :  { %975 = vmatprep.subr.bf16.mxu0 %v1026_v54 }
 0x2b8   :  { %976 = vmatpush3.bf16.xpose.msra.mxu0 %v742_v31 }
 0x2b9   :  { %977 = vmatprep.subr.bf16.mxu0 %v1026_v54 }
 0x2c0   :  { %978 = vmatpush3.bf16.xpose.msra.mxu0 %v739_v35 }
 0x2c1   :  { %979 = vmatprep.subr.bf16.mxu0 %v1026_v54 }
 0x2c8   :  { %980 = vmatpush3.bf16.xpose.msra.mxu0 %v736_v38 }
 0x2c9   :  { %981 = vmatprep.subr.bf16.mxu0 %v1026_v54 }
 0x2d0   :  { %982 = vmatpush3.bf16.xpose.msra.mxu0 %v733_v41 }
 0x2d1   :  { %983 = vmatprep.subr.bf16.mxu0 %v1026_v54 }
 0x2d8   :  { %984 = vmatpush3.bf16.xpose.msra.mxu0 %v730_v43 }
 0x2df   :  { %986 = vmatmul.mubr.msk.bf16.vlgmr.msra.gmra.mxu0 %vm398_vm4, %v723_v44 }
 0x39f   :  { %v787_v46 = vpop.f32.mrf.mxu0 }
 0x3a0   :  { %v788_v47 = vadd.f32 %v787_v46, %v725_v45 }
 0x3a1   :  { %v987_v48 = vpop.f32.mrf.mxu0 }
 0x3a2   :  { %793 = vst [vmem:[#allocation3] sm:$0xff] %v788_v47 }
 0x3a3   :  { %v790_v30 = vpop.f32.mrf.mxu0 }
 0x3a4   :  { %1014 = shalt.err (!%p1011_p4)
}
 0x3a5   :  { %803 = dma.vmem_to_hbm [thread:$0]  %s801_s13, 128, %s1320_s11, [#allocation4]   ;;  %v988_v49 = vpop.f32.mrf.mxu0 }
 0x3a6   :  { %1023 = dma.done.wait [#allocation4], 128  }
 0x3a7   :  { %1024 = vsyncadd [#allocation4], 4294967168 }
 0x3a8   :  { %807 = vsyncpa [#allocation4], 1 }

</bundles_post_ra>
